<compile_context>
chip_gen: v5e
topology: v5e:2x2
jax: 0.10.0
libtpu: 0.0.40
codegen_flags: <defaults>
</compile_context>

<pallas_src>
import jax
import jax.numpy as jnp
from jax.experimental import pallas as pl
from jax.experimental.pallas import tpu as pltpu


K = 28 * 28      # 784 contraction dim, kept unpadded (full-extent block dim)
H1 = 128         # fc1 width (lane-aligned)
H2_PAD = 128     # fc2 width 64 -> 128
OUT_PAD = 128    # output width 10 -> 128 (lane-dense unmasked stores)
N_CLASSES = 10

TB_MAX = 2048    # max batch-tile rows per grid step
NEG_BIG = -1e30  # mask value baked into padded fc3 bias columns


def _round_up(n, m):
    return (n + m - 1) // m * m


def mlp_kernel(x_ref, w1_ref, b1_ref, w2_ref, b2_ref, w3_ref, b3_ref, o_ref):
    # x arrives as f32 straight from HBM; cast to bf16 here for the MXU.
    x = x_ref[...].astype(jnp.bfloat16)                                # (TB, 784)

    # fc1 + ReLU (bf16 MXU, f32 accumulation)
    h1 = jnp.dot(x, w1_ref[...], preferred_element_type=jnp.float32) + b1_ref[...]
    h1 = jnp.maximum(h1, 0.0)                                          # (TB, 128) f32

    # fc2 + ReLU
    h2 = jnp.dot(h1.astype(w2_ref.dtype), w2_ref[...],
                 preferred_element_type=jnp.float32) + b2_ref[...]
    h2 = jnp.maximum(h2, 0.0)                                          # (TB, 128) f32

    # fc3: padded weight columns are exactly zero and padded bias columns are
    # -1e30, so padded logits are exactly -1e30 (exp underflows to 0, max over
    # the real 10 classes is unaffected). No per-tile masking needed.
    z = jnp.dot(h2.astype(w3_ref.dtype), w3_ref[...],
                preferred_element_type=jnp.float32) + b3_ref[...]      # (TB, 128) f32

    # Numerically stable log_softmax (f32 epilogue).
    m = jnp.max(z, axis=1, keepdims=True)
    s = z - m
    lse = jnp.log(jnp.sum(jnp.exp(s), axis=1, keepdims=True))
    o_ref[...] = (s - lse).astype(o_ref.dtype)                         # (TB, 128)


def pack_params(params):
    """Pad widths to lane-aligned sizes, cast weights to bf16 (biases stay f32).

    The fc3 bias padding is -1e30 so the padded logit columns never win the
    max / contribute to the logsumexp.
    """
    w1, b1, w2, b2, w3, b3 = params
    w1p = w1.astype(jnp.bfloat16)                                        # (784, 128)
    b1p = b1.astype(jnp.float32)                                         # (1, 128)
    w2p = jnp.zeros((H1, H2_PAD), jnp.float32).at[:, : w2.shape[1]].set(w2)
    b2p = jnp.zeros((1, H2_PAD), jnp.float32).at[:, : b2.shape[1]].set(b2)
    w3p = jnp.zeros((H2_PAD, OUT_PAD), jnp.float32)
    w3p = w3p.at[: w3.shape[0], : w3.shape[1]].set(w3)
    b3p = jnp.full((1, OUT_PAD), NEG_BIG, jnp.float32).at[:, : b3.shape[1]].set(b3)
    return (w1p, b1p,
            w2p.astype(jnp.bfloat16), b2p,
            w3p.astype(jnp.bfloat16), b3p)


@jax.jit
def simple_nn_forward(x_nchw, packed_params):
    """x_nchw: (B, 1, 28, 28). Returns (B, 10) float32 log-probabilities."""
    w1, b1, w2, b2, w3, b3 = packed_params

    B = x_nchw.shape[0]
    x = x_nchw.reshape(B, K).astype(jnp.float32)     # == torch x.view(-1, 784); free if f32

    # Tile selection: >= 2 grid steps when possible (v7x has 2 TensorCores and the
    # batch axis is "parallel"), tile close to ceil(B / n_steps) so zero-row padding
    # stays <= 7 rows per step instead of up to a whole tile.
    n_steps = max(2, pl.cdiv(B, TB_MAX))
    TB = min(_round_up(pl.cdiv(B, n_steps), 8), TB_MAX)
    B_pad = _round_up(B, TB)
    if B_pad > B:
        x = jnp.pad(x, ((0, B_pad - B), (0, 0)))

    grid = (B_pad // TB,)
    const = lambda shape: pl.BlockSpec(shape, lambda i: (0, 0))  # VMEM-resident params

    weight_bytes = (K * H1 + H1 * H2_PAD + H2_PAD * OUT_PAD) * 2 \
        + (H1 + H2_PAD + OUT_PAD) * 4
    cost = pl.CostEstimate(
        flops=2 * B_pad * (K * H1 + H1 * H2_PAD + H2_PAD * OUT_PAD),
        transcendentals=B_pad * (OUT_PAD + 1),
        bytes_accessed=B_pad * K * 4 + weight_bytes + B_pad * OUT_PAD * 4,
    )

    out = pl.pallas_call(
        mlp_kernel,
        out_shape=jax.ShapeDtypeStruct((B_pad, OUT_PAD), jnp.float32),
        grid_spec=pltpu.PrefetchScalarGridSpec(
            num_scalar_prefetch=0,
            grid=grid,
            in_specs=[
                pl.BlockSpec((TB, K), lambda i: (i, 0)),       # x: streamed per tile (f32)
                const((K, H1)), const((1, H1)),                # fc1
                const((H1, H2_PAD)), const((1, H2_PAD)),       # fc2
                const((H2_PAD, OUT_PAD)), const((1, OUT_PAD)), # fc3
            ],
            out_specs=pl.BlockSpec((TB, OUT_PAD), lambda i: (i, 0)),
        ),
        compiler_params=pltpu.CompilerParams(
            dimension_semantics=("parallel",),
            vmem_limit_bytes=40 << 20,   # fits TB=2048 f32 x double-buffered; v7x-safe
        ),
        cost_estimate=cost,
    )(x, w1, b1, w2, b2, w3, b3)

    return out[:B, :N_CLASSES]


def init_params(key):
    """Deterministic init matching nn.Linear shapes (stored transposed: (in, out))."""
    def linear(k, fan_in, fan_out):
        k_w, k_b = jax.random.split(k)
        bound = 1.0 / jnp.sqrt(fan_in)
        w = jax.random.uniform(k_w, (fan_in, fan_out), jnp.float32, -bound, bound)
        b = jax.random.uniform(k_b, (1, fan_out), jnp.float32, -bound, bound)
        return w, b

    k1, k2, k3 = jax.random.split(key, 3)
    w1, b1 = linear(k1, K, 128)
    w2, b2 = linear(k2, 128, 64)
    w3, b3 = linear(k3, 64, 10)
    return (w1, b1, w2, b2, w3, b3)


def reference_forward(x_nchw, params):
    """Plain-JAX f32 reference for sanity checking."""
    B = x_nchw.shape[0]
    x = x_nchw.reshape(B, K).astype(jnp.float32)
    w1, b1, w2, b2, w3, b3 = params
    h1 = jnp.maximum(x @ w1 + b1, 0.0)
    h2 = jnp.maximum(h1 @ w2 + b2, 0.0)
    z = h2 @ w3 + b3
    return jax.nn.log_softmax(z, axis=1)


if __name__ == "__main__":
    key = jax.random.PRNGKey(0)
    k_params, k_x = jax.random.split(key)

    params = init_params(k_params)
    packed = pack_params(params)

    # Small batch of MNIST-shaped inputs, NCHW like the PyTorch module expects.
    x = jax.random.normal(k_x, (8, 1, 28, 28), jnp.float32)

    out = simple_nn_forward(x, packed)
    out = jax.block_until_ready(out)

    ref = reference_forward(x, params)
    assert out.shape == (8, 10)
    # bf16 weights / in-kernel bf16 activations (f32 accumulation) vs pure-f32
    # reference: loose tolerance.
    assert jnp.allclose(out, ref, atol=2e-2, rtol=2e-2), float(jnp.max(jnp.abs(out - ref)))

    print("KERNEL_OK")
</pallas_src>

<mosaic_0001>
module attributes {stable_mosaic.version = 11 : i64} {
  func.func @mlp_kernel(%arg0: i32, %arg1: memref<8x784xf32, #tpu.memory_space<vmem>>, %arg2: memref<784x128xbf16, #tpu.memory_space<vmem>>, %arg3: memref<1x128xf32, #tpu.memory_space<vmem>>, %arg4: memref<128x128xbf16, #tpu.memory_space<vmem>>, %arg5: memref<1x128xf32, #tpu.memory_space<vmem>>, %arg6: memref<128x128xbf16, #tpu.memory_space<vmem>>, %arg7: memref<1x128xf32, #tpu.memory_space<vmem>>, %arg8: memref<8x128xf32, #tpu.memory_space<vmem>>) attributes {dimension_semantics = [#tpu.dimension_semantics<parallel>], iteration_bounds = array<i64: 1>, scalar_prefetch = 0 : i64, scratch_operands = 0 : i64, tpu.core_type = #tpu.core_type<tc>, window_params = [{transform_indices = @transform_0, window_bounds = array<i64: 8, 784>}, {pipeline_mode = #tpu.pipeline_mode<synchronous>, transform_indices = @transform_1, window_bounds = array<i64: 784, 128>}, {pipeline_mode = #tpu.pipeline_mode<synchronous>, transform_indices = @transform_2, window_bounds = array<i64: 1, 128>}, {pipeline_mode = #tpu.pipeline_mode<synchronous>, transform_indices = @transform_3, window_bounds = array<i64: 128, 128>}, {pipeline_mode = #tpu.pipeline_mode<synchronous>, transform_indices = @transform_4, window_bounds = array<i64: 1, 128>}, {pipeline_mode = #tpu.pipeline_mode<synchronous>, transform_indices = @transform_5, window_bounds = array<i64: 128, 128>}, {pipeline_mode = #tpu.pipeline_mode<synchronous>, transform_indices = @transform_6, window_bounds = array<i64: 1, 128>}, {transform_indices = @transform_7, window_bounds = array<i64: 8, 128>}]} {
    %c0 = arith.constant 0 : index
    %c0_0 = arith.constant 0 : index
    %0 = vector.load %arg1[%c0, %c0_0] : memref<8x784xf32, #tpu.memory_space<vmem>>, vector<8x784xf32>
    %1 = arith.truncf %0 : vector<8x784xf32> to vector<8x784xbf16>
    %c0_1 = arith.constant 0 : index
    %c0_2 = arith.constant 0 : index
    %2 = vector.load %arg2[%c0_1, %c0_2] : memref<784x128xbf16, #tpu.memory_space<vmem>>, vector<784x128xbf16>
    %cst = arith.constant dense<0.000000e+00> : vector<8x128xf32>
    %3 = tpu.matmul %1, %2, %cst {dimension_numbers = #tpu.dot_dimension_numbers<[1], [0], [0], [1], [0, 0, 1, 1], [], []>} : vector<8x784xbf16>, vector<784x128xbf16>, vector<8x128xf32> -> vector<8x128xf32>
    %c0_3 = arith.constant 0 : index
    %c0_4 = arith.constant 0 : index
    %4 = vector.load %arg3[%c0_3, %c0_4] : memref<1x128xf32, #tpu.memory_space<vmem>>, vector<1x128xf32>
    %5 = vector.broadcast %4 : vector<1x128xf32> to vector<8x128xf32>
    %6 = arith.addf %3, %5 : vector<8x128xf32>
    %cst_5 = arith.constant 0.000000e+00 : f32
    %7 = vector.broadcast %cst_5 : f32 to vector<8x128xf32>
    %8 = arith.maximumf %6, %7 : vector<8x128xf32>
    %9 = arith.truncf %8 : vector<8x128xf32> to vector<8x128xbf16>
    %c0_6 = arith.constant 0 : index
    %c0_7 = arith.constant 0 : index
    %10 = vector.load %arg4[%c0_6, %c0_7] : memref<128x128xbf16, #tpu.memory_space<vmem>>, vector<128x128xbf16>
    %cst_8 = arith.constant dense<0.000000e+00> : vector<8x128xf32>
    %11 = tpu.matmul %9, %10, %cst_8 {dimension_numbers = #tpu.dot_dimension_numbers<[1], [0], [0], [1], [0, 0, 1, 1], [], []>} : vector<8x128xbf16>, vector<128x128xbf16>, vector<8x128xf32> -> vector<8x128xf32>
    %c0_9 = arith.constant 0 : index
    %c0_10 = arith.constant 0 : index
    %12 = vector.load %arg5[%c0_9, %c0_10] : memref<1x128xf32, #tpu.memory_space<vmem>>, vector<1x128xf32>
    %13 = vector.broadcast %12 : vector<1x128xf32> to vector<8x128xf32>
    %14 = arith.addf %11, %13 : vector<8x128xf32>
    %cst_11 = arith.constant 0.000000e+00 : f32
    %15 = vector.broadcast %cst_11 : f32 to vector<8x128xf32>
    %16 = arith.maximumf %14, %15 : vector<8x128xf32>
    %17 = arith.truncf %16 : vector<8x128xf32> to vector<8x128xbf16>
    %c0_12 = arith.constant 0 : index
    %c0_13 = arith.constant 0 : index
    %18 = vector.load %arg6[%c0_12, %c0_13] : memref<128x128xbf16, #tpu.memory_space<vmem>>, vector<128x128xbf16>
    %cst_14 = arith.constant dense<0.000000e+00> : vector<8x128xf32>
    %19 = tpu.matmul %17, %18, %cst_14 {dimension_numbers = #tpu.dot_dimension_numbers<[1], [0], [0], [1], [0, 0, 1, 1], [], []>} : vector<8x128xbf16>, vector<128x128xbf16>, vector<8x128xf32> -> vector<8x128xf32>
    %c0_15 = arith.constant 0 : index
    %c0_16 = arith.constant 0 : index
    %20 = vector.load %arg7[%c0_15, %c0_16] : memref<1x128xf32, #tpu.memory_space<vmem>>, vector<1x128xf32>
    %21 = vector.broadcast %20 : vector<1x128xf32> to vector<8x128xf32>
    %22 = arith.addf %19, %21 : vector<8x128xf32>
    %cst_17 = arith.constant dense<0xFF800000> : vector<8xf32>
    %23 = vector.multi_reduction <maximumf>, %22, %cst_17 [1] : vector<8x128xf32> to vector<8xf32>
    %24 = vector.shape_cast %23 : vector<8xf32> to vector<8x1xf32>
    %25 = vector.broadcast %24 : vector<8x1xf32> to vector<8x128xf32>
    %26 = arith.subf %22, %25 : vector<8x128xf32>
    %27 = math.exp %26 : vector<8x128xf32>
    %cst_18 = arith.constant dense<0.000000e+00> : vector<8xf32>
    %28 = vector.multi_reduction <add>, %27, %cst_18 [1] : vector<8x128xf32> to vector<8xf32>
    %29 = vector.shape_cast %28 : vector<8xf32> to vector<8x1xf32>
    %30 = math.log %29 : vector<8x1xf32>
    %31 = vector.broadcast %30 : vector<8x1xf32> to vector<8x128xf32>
    %32 = arith.subf %26, %31 : vector<8x128xf32>
    %c0_19 = arith.constant 0 : index
    %c0_20 = arith.constant 0 : index
    %33 = vector.load %arg8[%c0_19, %c0_20] : memref<8x128xf32, #tpu.memory_space<vmem>>, vector<8x128xf32>
    tpu.vector_store %arg8[%c0_19, %c0_20], %32 {strides = array<i32>} : memref<8x128xf32, #tpu.memory_space<vmem>>, vector<8x128xf32>,
    return
  }
  func.func @transform_0(%arg0: i32) -> (i32, i32) {
    %c0_i32 = arith.constant 0 : i32
    %c0_i32_0 = arith.constant 0 : i32
    return %arg0, %c0_i32 : i32, i32
  }
  func.func @transform_1(%arg0: i32) -> (i32, i32) {
    %c0_i32 = arith.constant 0 : i32
    %c0_i32_0 = arith.constant 0 : i32
    %c0_i32_1 = arith.constant 0 : i32
    return %c0_i32, %c0_i32_0 : i32, i32
  }
  func.func @transform_2(%arg0: i32) -> (i32, i32) {
    %c0_i32 = arith.constant 0 : i32
    %c0_i32_0 = arith.constant 0 : i32
    %c0_i32_1 = arith.constant 0 : i32
    return %c0_i32, %c0_i32_0 : i32, i32
  }
  func.func @transform_3(%arg0: i32) -> (i32, i32) {
    %c0_i32 = arith.constant 0 : i32
    %c0_i32_0 = arith.constant 0 : i32
    %c0_i32_1 = arith.constant 0 : i32
    return %c0_i32, %c0_i32_0 : i32, i32
  }
  func.func @transform_4(%arg0: i32) -> (i32, i32) {
    %c0_i32 = arith.constant 0 : i32
    %c0_i32_0 = arith.constant 0 : i32
    %c0_i32_1 = arith.constant 0 : i32
    return %c0_i32, %c0_i32_0 : i32, i32
  }
  func.func @transform_5(%arg0: i32) -> (i32, i32) {
    %c0_i32 = arith.constant 0 : i32
    %c0_i32_0 = arith.constant 0 : i32
    %c0_i32_1 = arith.constant 0 : i32
    return %c0_i32, %c0_i32_0 : i32, i32
  }
  func.func @transform_6(%arg0: i32) -> (i32, i32) {
    %c0_i32 = arith.constant 0 : i32
    %c0_i32_0 = arith.constant 0 : i32
    %c0_i32_1 = arith.constant 0 : i32
    return %c0_i32, %c0_i32_0 : i32, i32
  }
  func.func @transform_7(%arg0: i32) -> (i32, i32) {
    %c0_i32 = arith.constant 0 : i32
    %c0_i32_0 = arith.constant 0 : i32
    return %arg0, %c0_i32 : i32, i32
  }
}

</mosaic_0001>

<bundles_post_ra>
// kernel: simple_nn_forward.1
= control target key start
LH: loop header
LB: loop body
LE: loop exit
PB: predicated region body
PF: predicated region fallthrough
CT: control target
= control target key end

     0   :  { %s1355_s0 = inlined_call_operand.vmem [shape: f32[8,784], index: 0, kind: input, shape index: {}]   ;;  %s1356_s1 = inlined_call_operand.vmem [shape: bf16[784,128], index: 1, kind: input, shape index: {}]   ;;  %s1357_s2 = inlined_call_operand.vmem [shape: f32[1,128], index: 2, kind: input, shape index: {}]   ;;  %s1358_s3 = inlined_call_operand.vmem [shape: bf16[128,128], index: 3, kind: input, shape index: {}]   ;;  %s1359_s4 = inlined_call_operand.vmem [shape: f32[1,128], index: 4, kind: input, shape index: {}]   ;;  %s1360_s5 = inlined_call_operand.vmem [shape: bf16[128,128], index: 5, kind: input, shape index: {}]   ;;  %s1361_s6 = inlined_call_operand.vmem [shape: f32[1,128], index: 6, kind: input, shape index: {}]   ;;  %s1362_s7 = inlined_call_operand.hbm [shape: f32[8,128], index: 7, kind: output, shape index: {}]  }
   0x1   :  { %v994_v0 = vld [vmem:[%s1356_s1 + $0x38] sm:$0xff]  ;;  %v993_v3 = vld [vmem:[%s1356_s1 + $0x30] sm:$0xff]  ;;  %v992_v8 = vld [vmem:[%s1356_s1 + $0x28] sm:$0xff] }
   0x2   :  { %v1002_v1 = vld [vmem:[%s1356_s1 + $0x78] sm:$0xff]  ;;  %442 = vmatpush.bf16.msra.mxu0 %v994_v0  ;;  %v1001_v4 = vld [vmem:[%s1356_s1 + $0x70] sm:$0xff]  ;;  %v1000_v9 = vld [vmem:[%s1356_s1 + $0x68] sm:$0xff] }
   0x3   :  { %v1010_v2 = vld [vmem:[%s1356_s1 + $0xb8] sm:$0xff]  ;;  %455 = vmatpush.bf16.msra.mxu1 %v1002_v1  ;;  %v1009_v5 = vld [vmem:[%s1356_s1 + $0xb0] sm:$0xff]  ;;  %v1008_v10 = vld [vmem:[%s1356_s1 + $0xa8] sm:$0xff] }
   0x4   :  { %468 = vmatpush.bf16.msra.mxu2 %v1010_v2  ;;  %v1018_v6 = vld [vmem:[%s1356_s1 + $0xf8] sm:$0xff]  ;;  %v1017_v7 = vld [vmem:[%s1356_s1 + $0xf0] sm:$0xff]  ;;  %v1016_v11 = vld [vmem:[%s1356_s1 + $0xe8] sm:$0xff] }
   0x5   :  { %481 = vmatpush.bf16.msra.mxu3 %v1018_v6  ;;  %v991_v12 = vld [vmem:[%s1356_s1 + $0x20] sm:$0xff]  ;;  %v990_v16 = vld [vmem:[%s1356_s1 + $0x18] sm:$0xff] }
   0x6   :  { %443 = vmatpush.bf16.msra.mxu0 %v993_v3  ;;  %v999_v13 = vld [vmem:[%s1356_s1 + $0x60] sm:$0xff]  ;;  %v998_v17 = vld [vmem:[%s1356_s1 + $0x58] sm:$0xff] }
   0x7   :  { %456 = vmatpush.bf16.msra.mxu1 %v1001_v4  ;;  %v1007_v14 = vld [vmem:[%s1356_s1 + $0xa0] sm:$0xff]  ;;  %v1006_v18 = vld [vmem:[%s1356_s1 + $0x98] sm:$0xff] }
   0x8   :  { %469 = vmatpush.bf16.msra.mxu2 %v1009_v5  ;;  %v1015_v15 = vld [vmem:[%s1356_s1 + $0xe0] sm:$0xff]  ;;  %v1014_v19 = vld [vmem:[%s1356_s1 + $0xd8] sm:$0xff] }
   0x9   :  { %482 = vmatpush.bf16.msra.mxu3 %v1017_v7 }
   0xa   :  { %444 = vmatpush.bf16.msra.mxu0 %v992_v8 }
   0xb   :  { %457 = vmatpush.bf16.msra.mxu1 %v1000_v9 }
   0xc   :  { %470 = vmatpush.bf16.msra.mxu2 %v1008_v10 }
   0xd   :  { %483 = vmatpush.bf16.msra.mxu3 %v1016_v11 }
   0xe   :  { %445 = vmatpush.bf16.msra.mxu0 %v991_v12 }
   0xf   :  { %458 = vmatpush.bf16.msra.mxu1 %v999_v13 }
  0x10   :  { %471 = vmatpush.bf16.msra.mxu2 %v1007_v14 }
  0x11   :  { %484 = vmatpush.bf16.msra.mxu3 %v1015_v15 }
  0x12   :  { %12 = vsyncpa [#allocation3], 0  ;;  %446 = vmatpush.bf16.msra.mxu0 %v990_v16  ;;  %v989_v20 = vld [vmem:[%s1356_s1 + $0x10] sm:$0xff]  ;;  %v988_v24 = vld [vmem:[%s1356_s1 + $0x8] sm:$0xff]  ;;  %vm438_vm0 = vcmask 130048   ;;  %s717_s9 = sshll.u32 %s1362_s7, 4  ;;  %s718_s9 = int_to_ptr.hbm [resolvable:$true] %s717_s9 }
  0x13   :  { %459 = vmatpush.bf16.msra.mxu1 %v998_v17  ;;  %v997_v21 = vld [vmem:[%s1356_s1 + $0x50] sm:$0xff]  ;;  %v996_v25 = vld [vmem:[%s1356_s1 + $0x48] sm:$0xff]  ;;  %v987_v27 = vld [vmem:[%s1356_s1] sm:$0xff] }
  0x14   :  { %472 = vmatpush.bf16.msra.mxu2 %v1006_v18  ;;  %v1005_v22 = vld [vmem:[%s1356_s1 + $0x90] sm:$0xff]  ;;  %v1004_v26 = vld [vmem:[%s1356_s1 + $0x88] sm:$0xff]  ;;  %v995_v29 = vld [vmem:[%s1356_s1 + $0x40] sm:$0xff] }
  0x15   :  { %485 = vmatpush.bf16.msra.mxu3 %v1014_v19  ;;  %v1013_v23 = vld [vmem:[%s1356_s1 + $0xd0] sm:$0xff]  ;;  %v1012_v28 = vld [vmem:[%s1356_s1 + $0xc8] sm:$0xff]  ;;  %v28_v30 = vld [vmem:[%s1355_s0] sm:$0xff] }
  0x16   :  { %447 = vmatpush.bf16.msra.mxu0 %v989_v20  ;;  %v29_v31 = vld [vmem:[%s1355_s0 + $0x8] sm:$0xff]  ;;  %v1026_v32 = vld [vmem:[%s1356_s1 + $0x138] sm:$0xff]  ;;  %v1003_v34 = vld [vmem:[%s1356_s1 + $0x80] sm:$0xff]  ;;  %v35_v36 = vpack.c.bf16 %v28_v30, %v28_v30 }
  0x17   :  { %460 = vmatpush.bf16.msra.mxu1 %v997_v21  ;;  %v1034_v33 = vld [vmem:[%s1356_s1 + $0x178] sm:$0xff]  ;;  %v30_v35 = vld [vmem:[%s1355_s0 + $0x10] sm:$0xff]  ;;  %v36_v37 = vpack.c.bf16 %v29_v31, %v29_v31  ;;  %v1011_v38 = vld [vmem:[%s1356_s1 + $0xc0] sm:$0xff] }
  0x18   :  { %473 = vmatpush.bf16.msra.mxu2 %v1005_v22  ;;  %v1035_v39 = vld [vmem:[%s1356_s1 + $0x180] sm:$0xff]  ;;  %v31_v40 = vld [vmem:[%s1355_s0 + $0x18] sm:$0xff]  ;;  %v1025_v41 = vld [vmem:[%s1356_s1 + $0x130] sm:$0xff]  ;;  %v37_v43 = vpack.c.bf16 %v30_v35, %v30_v35 }
  0x19   :  { %486 = vmatpush.bf16.msra.mxu3 %v1013_v23  ;;  %v1033_v42 = vld [vmem:[%s1356_s1 + $0x170] sm:$0xff]  ;;  %v38_v44 = vpack.c.bf16 %v31_v40, %v31_v40  ;;  %v1024_v45 = vld [vmem:[%s1356_s1 + $0x128] sm:$0xff]  ;;  %v1023_v47 = vld [vmem:[%s1356_s1 + $0x120] sm:$0xff] }
  0x1a   :  { %448 = vmatpush.bf16.msra.mxu0 %v988_v24  ;;  %v1032_v46 = vld [vmem:[%s1356_s1 + $0x168] sm:$0xff]  ;;  %v1031_v48 = vld [vmem:[%s1356_s1 + $0x160] sm:$0xff]  ;;  %v1022_v49 = vld [vmem:[%s1356_s1 + $0x118] sm:$0xff] }
  0x1b   :  { %461 = vmatpush.bf16.msra.mxu1 %v996_v25  ;;  %v1030_v50 = vld [vmem:[%s1356_s1 + $0x158] sm:$0xff]  ;;  %v34_v51 = vld [vmem:[%s1355_s0 + $0x30] sm:$0xff]  ;;  %v1020_v55 = vld [vmem:[%s1356_s1 + $0x108] sm:$0xff] }
  0x1c   :  { %474 = vmatpush.bf16.msra.mxu2 %v1004_v26  ;;  %v1021_v52 = vld [vmem:[%s1356_s1 + $0x110] sm:$0xff]  ;;  %v41_v54 = vpack.c.bf16 %v34_v51, %v34_v51  ;;  %v1028_v56 = vld [vmem:[%s1356_s1 + $0x148] sm:$0xff]  ;;  %v1019_v57 = vld [vmem:[%s1356_s1 + $0x100] sm:$0xff] }
  0x1d   :  { %487 = vmatpush.bf16.msra.mxu3 %v1012_v28  ;;  %v1029_v53 = vld [vmem:[%s1356_s1 + $0x150] sm:$0xff]  ;;  %v1027_v58 = vld [vmem:[%s1356_s1 + $0x140] sm:$0xff]  ;;  %v33_v60 = vld [vmem:[%s1355_s0 + $0x28] sm:$0xff] }
  0x1e   :  { %449 = vmatpush.bf16.msra.mxu0 %v987_v27  ;;  %v32_v59 = vld [vmem:[%s1355_s0 + $0x20] sm:$0xff]  ;;  %v40_v62 = vpack.c.bf16 %v33_v60, %v33_v60  ;;  %v1043_v63 = vld [vmem:[%s1358_s3 + $0x38] sm:$0xff]  ;;  %v1042_v0 = vld [vmem:[%s1358_s3 + $0x30] sm:$0xff] }
  0x1f   :  { %462 = vmatpush.bf16.msra.mxu1 %v995_v29  ;;  %v39_v61 = vpack.c.bf16 %v32_v59, %v32_v59  ;;  %v1041_v1 = vld [vmem:[%s1358_s3 + $0x28] sm:$0xff]  ;;  %v1040_v2 = vld [vmem:[%s1358_s3 + $0x20] sm:$0xff]  ;;  %v1039_v3 = vld [vmem:[%s1358_s3 + $0x18] sm:$0xff] }
  0x20   :  { %475 = vmatpush.bf16.msra.mxu2 %v1003_v34  ;;  %v1038_v4 = vld [vmem:[%s1358_s3 + $0x10] sm:$0xff]  ;;  %v1037_v5 = vld [vmem:[%s1358_s3 + $0x8] sm:$0xff]  ;;  %v1036_v8 = vld [vmem:[%s1358_s3] sm:$0xff] }
  0x21   :  { %450 = vmatmul.bf16.vlgmr.msra.gmra.mxu0 %v35_v36  ;;  %488 = vmatpush.bf16.msra.mxu3 %v1011_v38  ;;  %v1051_v11 = vld [vmem:[%s1360_s5 + $0x38] sm:$0xff]  ;;  %v1050_v14 = vld [vmem:[%s1360_s5 + $0x30] sm:$0xff]  ;;  %v1053_v15 = vld [vmem:[%s1357_s2] ss:$0 sm:$0xff] }
  0x22   :  { %494 = vmatpush.bf16.msrb.mxu0 %v1026_v32  ;;  %463 = vmatmul.bf16.vlgmr.msra.gmra.mxu1 %v36_v37  ;;  %v1049_v16 = vld [vmem:[%s1360_s5 + $0x28] sm:$0xff]  ;;  %v1048_v20 = vld [vmem:[%s1360_s5 + $0x20] sm:$0xff]  ;;  %v1047_v22 = vld [vmem:[%s1360_s5 + $0x18] sm:$0xff] }
  0x23   :  { %507 = vmatpush.bf16.msrb.mxu1 %v1034_v33  ;;  %476 = vmatmul.bf16.vlgmr.msra.gmra.mxu2 %v37_v43  ;;  %v1046_v25 = vld [vmem:[%s1360_s5 + $0x10] sm:$0xff]  ;;  %v1045_v37 = vld [vmem:[%s1360_s5 + $0x8] sm:$0xff]  ;;  %v1044_v38 = vld [vmem:[%s1360_s5] sm:$0xff] }
  0x24   :  { %527 = vmatpush.bf16.msrb.mxu2 %v1035_v39  ;;  %489 = vmatmul.bf16.vlgmr.msra.gmra.mxu3 %v38_v44  ;;  %v1054_v39 = vld [vmem:[%s1359_s4] ss:$0 sm:$0xff]  ;;  %s1086_s4 = smov [#allocation2]  }
  0x25   :  { %603 = vmatpush.bf16.msrb.mxu3 %v1043_v63  ;;  %s715_s5 = sshll.u32 %s1086_s4, 4  ;;  %s716_s5 = int_to_ptr.vmem [resolvable:$true] %s715_s5 }
  0x26   :  { %495 = vmatpush.bf16.msrb.mxu0 %v1025_v41 }
  0x27   :  { %508 = vmatpush.bf16.msrb.mxu1 %v1033_v42 }
  0x28   :  { %686 = vmatpush.bf16.msra.mxu2 %v1051_v11 }
  0x29   :  { %604 = vmatpush.bf16.msrb.mxu3 %v1042_v0 }
  0x2a   :  { %496 = vmatpush.bf16.msrb.mxu0 %v1024_v45  ;;  %v1055_v45 = vld [vmem:[%s1361_s6] ss:$0 sm:$0xff] }
  0x2b   :  { %509 = vmatpush.bf16.msrb.mxu1 %v1032_v46 }
  0x2c   :  { %687 = vmatpush.bf16.msra.mxu2 %v1050_v14 }
  0x2d   :  { %605 = vmatpush.bf16.msrb.mxu3 %v1041_v1 }
  0x2e   :  { %497 = vmatpush.bf16.msrb.mxu0 %v1023_v47 }
  0x2f   :  { %510 = vmatpush.bf16.msrb.mxu1 %v1031_v48 }
  0x30   :  { %688 = vmatpush.bf16.msra.mxu2 %v1049_v16 }
  0x31   :  { %606 = vmatpush.bf16.msrb.mxu3 %v1040_v2 }
  0x32   :  { %498 = vmatpush.bf16.msrb.mxu0 %v1022_v49 }
  0x33   :  { %511 = vmatpush.bf16.msrb.mxu1 %v1030_v50  ;;  %922 = vmatmul.msk.bf16.vlgmr.msrb.gmra.mxu2 %vm438_vm0, %v41_v54 }
  0x34   :  { %689 = vmatpush.bf16.msra.mxu2 %v1048_v20 }
  0x35   :  { %607 = vmatpush.bf16.msrb.mxu3 %v1039_v3 }
  0x36   :  { %499 = vmatpush.bf16.msrb.mxu0 %v1021_v52 }
  0x37   :  { %512 = vmatpush.bf16.msrb.mxu1 %v1029_v53 }
  0x38   :  { %690 = vmatpush.bf16.msra.mxu2 %v1047_v22 }
  0x39   :  { %608 = vmatpush.bf16.msrb.mxu3 %v1038_v4 }
  0x3a   :  { %500 = vmatpush.bf16.msrb.mxu0 %v1020_v55 }
  0x3b   :  { %513 = vmatpush.bf16.msrb.mxu1 %v1028_v56 }
  0x3c   :  { %691 = vmatpush.bf16.msra.mxu2 %v1046_v25 }
  0x3d   :  { %609 = vmatpush.bf16.msrb.mxu3 %v1037_v5 }
  0x3e   :  { %501 = vmatpush.bf16.msrb.mxu0 %v1019_v57 }
  0x3f   :  { %514 = vmatpush.bf16.msrb.mxu1 %v1027_v58 }
  0x40   :  { %692 = vmatpush.bf16.msra.mxu2 %v1045_v37 }
  0x41   :  { %502 = vmatmul.bf16.vlgmr.msrb.gmra.mxu0 %v39_v61  ;;  %610 = vmatpush.bf16.msrb.mxu3 %v1036_v8 }
  0x42   :  { %515 = vmatmul.bf16.vlgmr.msrb.gmra.mxu1 %v40_v62 }
  0x44   :  { %693 = vmatpush.bf16.msra.mxu2 %v1044_v38 }
  0x9e   :  { %v451_v6 = vpop.f32.mrf.mxu0 }
  0x9f   :  { %v464_v7 = vpop.f32.mrf.mxu1  ;;  %v452_v17 = vadd.f32 %v1053_v15, %v451_v6 }
  0xa1   :  { %v465_v21 = vadd.f32 %v464_v7, %v452_v17 }
  0xa6   :  { %v453_v9 = vpop.f32.mrf.mxu0  ;;  %v477_v12 = vpop.f32.mrf.mxu2 }
  0xa7   :  { %v466_v10 = vpop.f32.mrf.mxu1  ;;  %v490_v13 = vpop.f32.mrf.mxu3  ;;  %v478_v23 = vadd.f32 %v477_v12, %v465_v21 }
  0xa9   :  { %v491_v26 = vadd.f32 %v490_v13, %v478_v23 }
  0xae   :  { %v479_v18 = vpop.f32.mrf.mxu2 }
  0xaf   :  { %v492_v19 = vpop.f32.mrf.mxu3 }
  0xb6   :  { %v529_v24 = vpop.f32.mrf.mxu2 }
  0xbe   :  { %v503_v27 = vpop.f32.mrf.mxu0  ;;  %v531_v31 = vpop.f32.mrf.mxu2 }
  0xbf   :  { %v516_v28 = vpop.f32.mrf.mxu1  ;;  %v504_v29 = vadd.f32 %v503_v27, %v491_v26 }
  0xc1   :  { %v517_v30 = vadd.f32 %v516_v28, %v504_v29 }
  0xc3   :  { %v530_v32 = vadd.f32 %v529_v24, %v517_v30 }
  0xc5   :  { %v533_v33 = vmax.f32 %v530_v32, 0.0 }
  0xc6   :  { %v505_v34 = vpop.f32.mrf.mxu0 }
  0xc7   :  { %v518_v35 = vpop.f32.mrf.mxu1  ;;  %v534_v36 = vpack.c.bf16 %v533_v33, %v533_v33 }
  0xc9   :  { %611 = vmatmul.bf16.vlgmr.msrb.gmra.mxu3 %v534_v36 }
 0x14c   :  { %v612_v40 = vpop.f32.mrf.mxu3 }
 0x14d   :  { %v613_v41 = vadd.f32 %v1054_v39, %v612_v40 }
 0x14f   :  { %v616_v42 = vmax.f32 %v613_v41, 0.0 }
 0x151   :  { %v617_v43 = vpack.c.bf16 %v616_v42, %v616_v42 }
 0x153   :  { %694 = vmatmul.bf16.vlgmr.msra.gmra.mxu2 %v617_v43 }
 0x154   :  { %v614_v44 = vpop.f32.mrf.mxu3 }
 0x1d6   :  { %v695_v46 = vpop.f32.mrf.mxu2 }
 0x1d7   :  { %v696_v47 = vadd.f32 %v1055_v45, %v695_v46 }
 0x1d9   :  { %699 = vmax.xlane.f32.xlu0 %v696_v47 }
 0x1de   :  { %v697_v48 = vpop.f32.mrf.mxu2 }
 0x24c   :  { %v700_v49 = vpop.xlane.xlu0 %699 }
 0x24d   :  { %v701_v50 = vsub.f32 %v696_v47, %v700_v49 }
 0x24f   :  { %v702_v51 = vmul.f32 1.442695, %v701_v50 }
 0x251   :  { %1056 = vpow2.f32 %v702_v51 }
 0x257   :  { %v1057_v52 = vpop.eup %1056 }
 0x258   :  { %704 = vadd.xlane.f32.xlu0 %v1057_v52 }
 0x2cb   :  { %v705_v53 = vpop.xlane.xlu0 %704 }
 0x2cc   :  { %1058 = vlog2.f32 %v705_v53 }
 0x2d2   :  { %v1059_v54 = vpop.eup %1058 }
 0x2d3   :  { %v707_v55 = vmul.f32 0.6931472, %v1059_v54 }
 0x2d5   :  { %v708_v56 = vsub.f32 %v701_v50, %v707_v55 }
 0x2d7   :  { %709 = vst [vmem:[#allocation2] sm:$0xff] %v708_v56 }
 0x2d8   :  { %720 = dma.vmem_to_hbm [thread:$0]  %s716_s5, 128, %s718_s9, [#allocation3]  }
 0x2d9   :  { %1084 = dma.done.wait [#allocation3], 128  }
 0x2da   :  { %1085 = vsyncadd [#allocation3], 4294967168 }
 0x2db   :  { %725 = vsyncpa [#allocation3], 1 }

</bundles_post_ra>
